<compile_context>
chip_gen: v7x
topology: tpu7x:2x2x1
jax: 0.10.0
libtpu: 0.0.40
codegen_flags: <defaults>
</compile_context>

<pallas_src>
import functools

import jax
import jax.numpy as jnp
from jax.experimental import pallas as pl
from jax.experimental.pallas import tpu as pltpu

H = 128
FF = 512
LN_EPS = 1e-5  # PyTorch nn.LayerNorm default


def bert_ffn_kernel(attn_ref, x_ref,
                    w0_ref, b0_ref, g0_ref, be0_ref,
                    w1_ref, b1_ref,
                    w2_ref, b2_ref, g2_ref, be2_ref,
                    o_ref):
    # Residual input in f32 for the VPU.
    x = x_ref[...].astype(jnp.float32)

    # Linear(H, H): bf16 x bf16 operands, f32 accumulation on the MXU.
    # Cast attn in-kernel (no separate HBM astype pass in the wrapper).
    a = attn_ref[...].astype(jnp.bfloat16)
    y0 = jnp.dot(a, w0_ref[...], preferred_element_type=jnp.float32) + b0_ref[...]
    h = y0 + x

    # LayerNorm 0 -- two-pass variance (computed from h - mu) for robustness.
    mu = jnp.mean(h, axis=-1, keepdims=True)
    d = h - mu
    var = jnp.mean(d * d, axis=-1, keepdims=True)
    hn = d * jax.lax.rsqrt(var + LN_EPS)
    hn = hn * g0_ref[...] + be0_ref[...]

    # FFN: Linear(H, FF) -> ReLU -> Linear(FF, H); bf16 into the MXU, f32 out.
    f = jnp.dot(hn.astype(jnp.bfloat16), w1_ref[...],
                preferred_element_type=jnp.float32) + b1_ref[...]
    f = jnp.maximum(f, 0.0)
    f2 = jnp.dot(f.astype(jnp.bfloat16), w2_ref[...],
                 preferred_element_type=jnp.float32) + b2_ref[...]

    # Residual + LayerNorm 2 (two-pass).
    h2 = f2 + hn
    mu2 = jnp.mean(h2, axis=-1, keepdims=True)
    d2 = h2 - mu2
    var2 = jnp.mean(d2 * d2, axis=-1, keepdims=True)
    out = d2 * jax.lax.rsqrt(var2 + LN_EPS)
    out = out * g2_ref[...] + be2_ref[...]

    o_ref[...] = out.astype(o_ref.dtype)


@functools.partial(jax.jit, static_argnames=("tm",))
def bert_ffn(attn_out, x, params, *, tm=1024):
    """attn_out, x: [B, S, H]  ->  [B, S, H] (dtype follows attn_out)."""
    B, S, Hdim = attn_out.shape
    assert Hdim == H
    M = B * S

    # Row tile: multiple of 256 (full MXU LHS pushes), capped by the row count
    # rounded up to a sublane multiple.  No host-side padding -- the grid uses
    # pl.cdiv and Pallas masks the ragged last block.
    tm = max(256, (tm // 256) * 256)
    tm_eff = min(tm, ((M + 7) // 8) * 8)
    grid_m = pl.cdiv(M, tm_eff)

    # Free reshapes only (no pad / astype / slice passes over activations).
    a2 = attn_out.reshape(M, H)
    x2 = x.reshape(M, H)

    (w0, b0, g0, be0, w1, b1, w2, b2, g2, be2) = params
    # Weights -> bf16 MXU operands (tiny, one-time); biases / LN params stay f32.
    w0b = w0.astype(jnp.bfloat16)
    w1b = w1.astype(jnp.bfloat16)
    w2b = w2.astype(jnp.bfloat16)

    row = pl.BlockSpec((tm_eff, H), lambda i: (i, 0))
    full = lambda shape: pl.BlockSpec(shape, lambda i: (0, 0))

    # Advisory cost estimate.
    out_dtype = attn_out.dtype
    act_bytes = attn_out.dtype.itemsize + x.dtype.itemsize + jnp.dtype(out_dtype).itemsize
    flops = 2 * M * (H * H + 2 * H * FF)
    bytes_accessed = (M * H * act_bytes
                      + (H * H + 2 * H * FF) * 2         # bf16 weights
                      + (3 * H + FF + 4 * H) * 4)        # biases + LN params
    cost = pl.CostEstimate(flops=flops,
                           transcendentals=2 * M,
                           bytes_accessed=bytes_accessed)

    out = pl.pallas_call(
        bert_ffn_kernel,
        out_shape=jax.ShapeDtypeStruct((M, H), out_dtype),
        grid_spec=pltpu.PrefetchScalarGridSpec(
            num_scalar_prefetch=0,
            grid=(grid_m,),
            in_specs=[
                row,                 # attn_out tile (input dtype, cast in-kernel)
                row,                 # x tile
                full((H, H)),        # w0 (bf16)
                full((1, H)),        # b0
                full((1, H)),        # ln0 gamma
                full((1, H)),        # ln0 beta
                full((H, FF)),       # w1 (bf16)
                full((1, FF)),       # b1
                full((FF, H)),       # w2 (bf16)
                full((1, H)),        # b2
                full((1, H)),        # ln2 gamma
                full((1, H)),        # ln2 beta
            ],
            out_specs=row,
        ),
        compiler_params=pltpu.CompilerParams(
            dimension_semantics=("parallel",)),
        cost_estimate=cost,
    )(a2, x2, w0b, b0, g0, be0, w1b, b1, w2b, b2, g2, be2)

    return out.reshape(B, S, H)


def init_params(key):
    ks = jax.random.split(key, 6)
    # Weights stored as [in, out] (pre-transposed vs. torch Linear's [out, in]).
    w0 = jax.random.normal(ks[0], (H, H), jnp.float32) * 0.02
    b0 = jax.random.normal(ks[1], (1, H), jnp.float32) * 0.02
    w1 = jax.random.normal(ks[2], (H, FF), jnp.float32) * 0.02
    b1 = jax.random.normal(ks[3], (1, FF), jnp.float32) * 0.02
    w2 = jax.random.normal(ks[4], (FF, H), jnp.float32) * 0.02
    b2 = jax.random.normal(ks[5], (1, H), jnp.float32) * 0.02
    g0 = jnp.ones((1, H), jnp.float32)
    be0 = jnp.zeros((1, H), jnp.float32)
    g2 = jnp.ones((1, H), jnp.float32)
    be2 = jnp.zeros((1, H), jnp.float32)
    return (w0, b0, g0, be0, w1, b1, w2, b2, g2, be2)


def reference(attn_out, x, params):
    (w0, b0, g0, be0, w1, b1, w2, b2, g2, be2) = params

    def ln(h, g, b):
        mu = jnp.mean(h, axis=-1, keepdims=True)
        var = jnp.mean((h - mu) ** 2, axis=-1, keepdims=True)
        return (h - mu) / jnp.sqrt(var + LN_EPS) * g + b

    h = ln(attn_out @ w0 + b0 + x, g0, be0)
    f = jnp.maximum(h @ w1 + b1, 0.0) @ w2 + b2
    return ln(f + h, g2, be2)


if __name__ == "__main__":
    key = jax.random.PRNGKey(0)
    kp, ka, kx = jax.random.split(key, 3)
    params = init_params(kp)

    B, S = 2, 8
    attn_out = jax.random.normal(ka, (B, S, H), jnp.float32)
    x = jax.random.normal(kx, (B, S, H), jnp.float32)

    out = bert_ffn(attn_out, x, params)
    out = jax.block_until_ready(out)

    ref = reference(attn_out, x, params)
    assert out.shape == (B, S, H)
    # bf16 MXU operands (f32 accumulation) -> loosen tolerance vs. pure-f32 ref.
    assert jnp.allclose(out, ref, atol=1e-2, rtol=1e-2), float(
        jnp.max(jnp.abs(out - ref)))

    print("KERNEL_OK")
</pallas_src>

<mosaic_0001>
module attributes {stable_mosaic.version = 11 : i64} {
  func.func @bert_ffn_kernel(%arg0: i32, %arg1: memref<16x128xf32, #tpu.memory_space<vmem>>, %arg2: memref<16x128xf32, #tpu.memory_space<vmem>>, %arg3: memref<128x128xbf16, #tpu.memory_space<vmem>>, %arg4: memref<1x128xf32, #tpu.memory_space<vmem>>, %arg5: memref<1x128xf32, #tpu.memory_space<vmem>>, %arg6: memref<1x128xf32, #tpu.memory_space<vmem>>, %arg7: memref<128x512xbf16, #tpu.memory_space<vmem>>, %arg8: memref<1x512xf32, #tpu.memory_space<vmem>>, %arg9: memref<512x128xbf16, #tpu.memory_space<vmem>>, %arg10: memref<1x128xf32, #tpu.memory_space<vmem>>, %arg11: memref<1x128xf32, #tpu.memory_space<vmem>>, %arg12: memref<1x128xf32, #tpu.memory_space<vmem>>, %arg13: memref<16x128xf32, #tpu.memory_space<vmem>>) attributes {dimension_semantics = [#tpu.dimension_semantics<parallel>], iteration_bounds = array<i64: 1>, scalar_prefetch = 0 : i64, scratch_operands = 0 : i64, tpu.core_type = #tpu.core_type<tc>, window_params = [{transform_indices = @transform_0, window_bounds = array<i64: 16, 128>}, {transform_indices = @transform_1, window_bounds = array<i64: 16, 128>}, {pipeline_mode = #tpu.pipeline_mode<synchronous>, transform_indices = @transform_2, window_bounds = array<i64: 128, 128>}, {pipeline_mode = #tpu.pipeline_mode<synchronous>, transform_indices = @transform_3, window_bounds = array<i64: 1, 128>}, {pipeline_mode = #tpu.pipeline_mode<synchronous>, transform_indices = @transform_4, window_bounds = array<i64: 1, 128>}, {pipeline_mode = #tpu.pipeline_mode<synchronous>, transform_indices = @transform_5, window_bounds = array<i64: 1, 128>}, {pipeline_mode = #tpu.pipeline_mode<synchronous>, transform_indices = @transform_6, window_bounds = array<i64: 128, 512>}, {pipeline_mode = #tpu.pipeline_mode<synchronous>, transform_indices = @transform_7, window_bounds = array<i64: 1, 512>}, {pipeline_mode = #tpu.pipeline_mode<synchronous>, transform_indices = @transform_8, window_bounds = array<i64: 512, 128>}, {pipeline_mode = #tpu.pipeline_mode<synchronous>, transform_indices = @transform_9, window_bounds = array<i64: 1, 128>}, {pipeline_mode = #tpu.pipeline_mode<synchronous>, transform_indices = @transform_10, window_bounds = array<i64: 1, 128>}, {pipeline_mode = #tpu.pipeline_mode<synchronous>, transform_indices = @transform_11, window_bounds = array<i64: 1, 128>}, {transform_indices = @transform_12, window_bounds = array<i64: 16, 128>}]} {
    %c0 = arith.constant 0 : index
    %c0_0 = arith.constant 0 : index
    %0 = vector.load %arg2[%c0, %c0_0] : memref<16x128xf32, #tpu.memory_space<vmem>>, vector<16x128xf32>
    %c0_1 = arith.constant 0 : index
    %c0_2 = arith.constant 0 : index
    %1 = vector.load %arg1[%c0_1, %c0_2] : memref<16x128xf32, #tpu.memory_space<vmem>>, vector<16x128xf32>
    %2 = arith.truncf %1 : vector<16x128xf32> to vector<16x128xbf16>
    %c0_3 = arith.constant 0 : index
    %c0_4 = arith.constant 0 : index
    %3 = vector.load %arg3[%c0_3, %c0_4] : memref<128x128xbf16, #tpu.memory_space<vmem>>, vector<128x128xbf16>
    %cst = arith.constant dense<0.000000e+00> : vector<16x128xf32>
    %4 = tpu.matmul %2, %3, %cst {dimension_numbers = #tpu.dot_dimension_numbers<[1], [0], [0], [1], [0, 0, 1, 1], [], []>} : vector<16x128xbf16>, vector<128x128xbf16>, vector<16x128xf32> -> vector<16x128xf32>
    %c0_5 = arith.constant 0 : index
    %c0_6 = arith.constant 0 : index
    %5 = vector.load %arg4[%c0_5, %c0_6] : memref<1x128xf32, #tpu.memory_space<vmem>>, vector<1x128xf32>
    %6 = vector.broadcast %5 : vector<1x128xf32> to vector<16x128xf32>
    %7 = arith.addf %4, %6 : vector<16x128xf32>
    %8 = arith.addf %7, %0 : vector<16x128xf32>
    %cst_7 = arith.constant dense<0.000000e+00> : vector<16xf32>
    %9 = vector.multi_reduction <add>, %8, %cst_7 [1] : vector<16x128xf32> to vector<16xf32>
    %10 = vector.shape_cast %9 : vector<16xf32> to vector<16x1xf32>
    %cst_8 = arith.constant 1.280000e+02 : f32
    %11 = vector.broadcast %cst_8 : f32 to vector<16x1xf32>
    %12 = arith.divf %10, %11 : vector<16x1xf32>
    %13 = vector.broadcast %12 : vector<16x1xf32> to vector<16x128xf32>
    %14 = arith.subf %8, %13 : vector<16x128xf32>
    %15 = arith.mulf %14, %14 : vector<16x128xf32>
    %cst_9 = arith.constant dense<0.000000e+00> : vector<16xf32>
    %16 = vector.multi_reduction <add>, %15, %cst_9 [1] : vector<16x128xf32> to vector<16xf32>
    %17 = vector.shape_cast %16 : vector<16xf32> to vector<16x1xf32>
    %cst_10 = arith.constant 1.280000e+02 : f32
    %18 = vector.broadcast %cst_10 : f32 to vector<16x1xf32>
    %19 = arith.divf %17, %18 : vector<16x1xf32>
    %cst_11 = arith.constant 9.99999974E-6 : f32
    %20 = vector.broadcast %cst_11 : f32 to vector<16x1xf32>
    %21 = arith.addf %19, %20 : vector<16x1xf32>
    %22 = math.rsqrt %21 : vector<16x1xf32>
    %23 = vector.broadcast %22 : vector<16x1xf32> to vector<16x128xf32>
    %24 = arith.mulf %14, %23 : vector<16x128xf32>
    %c0_12 = arith.constant 0 : index
    %c0_13 = arith.constant 0 : index
    %25 = vector.load %arg5[%c0_12, %c0_13] : memref<1x128xf32, #tpu.memory_space<vmem>>, vector<1x128xf32>
    %26 = vector.broadcast %25 : vector<1x128xf32> to vector<16x128xf32>
    %27 = arith.mulf %24, %26 : vector<16x128xf32>
    %c0_14 = arith.constant 0 : index
    %c0_15 = arith.constant 0 : index
    %28 = vector.load %arg6[%c0_14, %c0_15] : memref<1x128xf32, #tpu.memory_space<vmem>>, vector<1x128xf32>
    %29 = vector.broadcast %28 : vector<1x128xf32> to vector<16x128xf32>
    %30 = arith.addf %27, %29 : vector<16x128xf32>
    %31 = arith.truncf %30 : vector<16x128xf32> to vector<16x128xbf16>
    %c0_16 = arith.constant 0 : index
    %c0_17 = arith.constant 0 : index
    %32 = vector.load %arg7[%c0_16, %c0_17] : memref<128x512xbf16, #tpu.memory_space<vmem>>, vector<128x512xbf16>
    %cst_18 = arith.constant dense<0.000000e+00> : vector<16x512xf32>
    %33 = tpu.matmul %31, %32, %cst_18 {dimension_numbers = #tpu.dot_dimension_numbers<[1], [0], [0], [1], [0, 0, 1, 1], [], []>} : vector<16x128xbf16>, vector<128x512xbf16>, vector<16x512xf32> -> vector<16x512xf32>
    %c0_19 = arith.constant 0 : index
    %c0_20 = arith.constant 0 : index
    %34 = vector.load %arg8[%c0_19, %c0_20] : memref<1x512xf32, #tpu.memory_space<vmem>>, vector<1x512xf32>
    %35 = vector.broadcast %34 : vector<1x512xf32> to vector<16x512xf32>
    %36 = arith.addf %33, %35 : vector<16x512xf32>
    %cst_21 = arith.constant 0.000000e+00 : f32
    %37 = vector.broadcast %cst_21 : f32 to vector<16x512xf32>
    %38 = arith.maximumf %36, %37 : vector<16x512xf32>
    %39 = arith.truncf %38 : vector<16x512xf32> to vector<16x512xbf16>
    %c0_22 = arith.constant 0 : index
    %c0_23 = arith.constant 0 : index
    %40 = vector.load %arg9[%c0_22, %c0_23] : memref<512x128xbf16, #tpu.memory_space<vmem>>, vector<512x128xbf16>
    %cst_24 = arith.constant dense<0.000000e+00> : vector<16x128xf32>
    %41 = tpu.matmul %39, %40, %cst_24 {dimension_numbers = #tpu.dot_dimension_numbers<[1], [0], [0], [1], [0, 0, 1, 1], [], []>} : vector<16x512xbf16>, vector<512x128xbf16>, vector<16x128xf32> -> vector<16x128xf32>
    %c0_25 = arith.constant 0 : index
    %c0_26 = arith.constant 0 : index
    %42 = vector.load %arg10[%c0_25, %c0_26] : memref<1x128xf32, #tpu.memory_space<vmem>>, vector<1x128xf32>
    %43 = vector.broadcast %42 : vector<1x128xf32> to vector<16x128xf32>
    %44 = arith.addf %41, %43 : vector<16x128xf32>
    %45 = arith.addf %44, %30 : vector<16x128xf32>
    %cst_27 = arith.constant dense<0.000000e+00> : vector<16xf32>
    %46 = vector.multi_reduction <add>, %45, %cst_27 [1] : vector<16x128xf32> to vector<16xf32>
    %47 = vector.shape_cast %46 : vector<16xf32> to vector<16x1xf32>
    %cst_28 = arith.constant 1.280000e+02 : f32
    %48 = vector.broadcast %cst_28 : f32 to vector<16x1xf32>
    %49 = arith.divf %47, %48 : vector<16x1xf32>
    %50 = vector.broadcast %49 : vector<16x1xf32> to vector<16x128xf32>
    %51 = arith.subf %45, %50 : vector<16x128xf32>
    %52 = arith.mulf %51, %51 : vector<16x128xf32>
    %cst_29 = arith.constant dense<0.000000e+00> : vector<16xf32>
    %53 = vector.multi_reduction <add>, %52, %cst_29 [1] : vector<16x128xf32> to vector<16xf32>
    %54 = vector.shape_cast %53 : vector<16xf32> to vector<16x1xf32>
    %cst_30 = arith.constant 1.280000e+02 : f32
    %55 = vector.broadcast %cst_30 : f32 to vector<16x1xf32>
    %56 = arith.divf %54, %55 : vector<16x1xf32>
    %cst_31 = arith.constant 9.99999974E-6 : f32
    %57 = vector.broadcast %cst_31 : f32 to vector<16x1xf32>
    %58 = arith.addf %56, %57 : vector<16x1xf32>
    %59 = math.rsqrt %58 : vector<16x1xf32>
    %60 = vector.broadcast %59 : vector<16x1xf32> to vector<16x128xf32>
    %61 = arith.mulf %51, %60 : vector<16x128xf32>
    %c0_32 = arith.constant 0 : index
    %c0_33 = arith.constant 0 : index
    %62 = vector.load %arg11[%c0_32, %c0_33] : memref<1x128xf32, #tpu.memory_space<vmem>>, vector<1x128xf32>
    %63 = vector.broadcast %62 : vector<1x128xf32> to vector<16x128xf32>
    %64 = arith.mulf %61, %63 : vector<16x128xf32>
    %c0_34 = arith.constant 0 : index
    %c0_35 = arith.constant 0 : index
    %65 = vector.load %arg12[%c0_34, %c0_35] : memref<1x128xf32, #tpu.memory_space<vmem>>, vector<1x128xf32>
    %66 = vector.broadcast %65 : vector<1x128xf32> to vector<16x128xf32>
    %67 = arith.addf %64, %66 : vector<16x128xf32>
    %c0_36 = arith.constant 0 : index
    %c0_37 = arith.constant 0 : index
    %68 = vector.load %arg13[%c0_36, %c0_37] : memref<16x128xf32, #tpu.memory_space<vmem>>, vector<16x128xf32>
    tpu.vector_store %arg13[%c0_36, %c0_37], %67 {strides = array<i32>} : memref<16x128xf32, #tpu.memory_space<vmem>>, vector<16x128xf32>,
    return
  }
  func.func @transform_0(%arg0: i32) -> (i32, i32) {
    %c0_i32 = arith.constant 0 : i32
    %c0_i32_0 = arith.constant 0 : i32
    return %arg0, %c0_i32 : i32, i32
  }
  func.func @transform_1(%arg0: i32) -> (i32, i32) {
    %c0_i32 = arith.constant 0 : i32
    %c0_i32_0 = arith.constant 0 : i32
    return %arg0, %c0_i32 : i32, i32
  }
  func.func @transform_2(%arg0: i32) -> (i32, i32) {
    %c0_i32 = arith.constant 0 : i32
    %c0_i32_0 = arith.constant 0 : i32
    %c0_i32_1 = arith.constant 0 : i32
    return %c0_i32, %c0_i32_0 : i32, i32
  }
  func.func @transform_3(%arg0: i32) -> (i32, i32) {
    %c0_i32 = arith.constant 0 : i32
    %c0_i32_0 = arith.constant 0 : i32
    %c0_i32_1 = arith.constant 0 : i32
    return %c0_i32, %c0_i32_0 : i32, i32
  }
  func.func @transform_4(%arg0: i32) -> (i32, i32) {
    %c0_i32 = arith.constant 0 : i32
    %c0_i32_0 = arith.constant 0 : i32
    %c0_i32_1 = arith.constant 0 : i32
    return %c0_i32, %c0_i32_0 : i32, i32
  }
  func.func @transform_5(%arg0: i32) -> (i32, i32) {
    %c0_i32 = arith.constant 0 : i32
    %c0_i32_0 = arith.constant 0 : i32
    %c0_i32_1 = arith.constant 0 : i32
    return %c0_i32, %c0_i32_0 : i32, i32
  }
  func.func @transform_6(%arg0: i32) -> (i32, i32) {
    %c0_i32 = arith.constant 0 : i32
    %c0_i32_0 = arith.constant 0 : i32
    %c0_i32_1 = arith.constant 0 : i32
    return %c0_i32, %c0_i32_0 : i32, i32
  }
  func.func @transform_7(%arg0: i32) -> (i32, i32) {
    %c0_i32 = arith.constant 0 : i32
    %c0_i32_0 = arith.constant 0 : i32
    %c0_i32_1 = arith.constant 0 : i32
    return %c0_i32, %c0_i32_0 : i32, i32
  }
  func.func @transform_8(%arg0: i32) -> (i32, i32) {
    %c0_i32 = arith.constant 0 : i32
    %c0_i32_0 = arith.constant 0 : i32
    %c0_i32_1 = arith.constant 0 : i32
    return %c0_i32, %c0_i32_0 : i32, i32
  }
  func.func @transform_9(%arg0: i32) -> (i32, i32) {
    %c0_i32 = arith.constant 0 : i32
    %c0_i32_0 = arith.constant 0 : i32
    %c0_i32_1 = arith.constant 0 : i32
    return %c0_i32, %c0_i32_0 : i32, i32
  }
  func.func @transform_10(%arg0: i32) -> (i32, i32) {
    %c0_i32 = arith.constant 0 : i32
    %c0_i32_0 = arith.constant 0 : i32
    %c0_i32_1 = arith.constant 0 : i32
    return %c0_i32, %c0_i32_0 : i32, i32
  }
  func.func @transform_11(%arg0: i32) -> (i32, i32) {
    %c0_i32 = arith.constant 0 : i32
    %c0_i32_0 = arith.constant 0 : i32
    %c0_i32_1 = arith.constant 0 : i32
    return %c0_i32, %c0_i32_0 : i32, i32
  }
  func.func @transform_12(%arg0: i32) -> (i32, i32) {
    %c0_i32 = arith.constant 0 : i32
    %c0_i32_0 = arith.constant 0 : i32
    return %arg0, %c0_i32 : i32, i32
  }
}

</mosaic_0001>

<bundles_post_ra>
// kernel: bert_ffn.1
= control target key start
LH: loop header
LB: loop body
LE: loop exit
PB: predicated region body
PF: predicated region fallthrough
CT: control target
= control target key end

     0   :  { %v1198_v1 = vmov 0.0   ;;  %vm1199_vm0 = vmmov 0   ;;  %s1548_s0 = inlined_call_operand.vmem [shape: f32[16,128], index: 0, kind: input, shape index: {}]   ;;  %s1549_s1 = inlined_call_operand.vmem [shape: f32[16,128], index: 1, kind: input, shape index: {}]   ;;  %s1550_s2 = inlined_call_operand.vmem [shape: bf16[128,128], index: 2, kind: input, shape index: {}]   ;;  %s1551_s3 = inlined_call_operand.vmem [shape: f32[1,128], index: 3, kind: input, shape index: {}]   ;;  %s1552_s4 = inlined_call_operand.vmem [shape: f32[1,128], index: 4, kind: input, shape index: {}]   ;;  %s1553_s5 = inlined_call_operand.vmem [shape: f32[1,128], index: 5, kind: input, shape index: {}]   ;;  %s1554_s6 = inlined_call_operand.vmem [shape: bf16[128,512], index: 6, kind: input, shape index: {}]   ;;  %s1555_s7 = inlined_call_operand.vmem [shape: f32[1,512], index: 7, kind: input, shape index: {}]   ;;  %s1556_s8 = inlined_call_operand.vmem [shape: bf16[512,128], index: 8, kind: input, shape index: {}]   ;;  %s1557_s9 = inlined_call_operand.vmem [shape: f32[1,128], index: 9, kind: input, shape index: {}]   ;;  %s1558_s10 = inlined_call_operand.vmem [shape: f32[1,128], index: 10, kind: input, shape index: {}]   ;;  %s1559_s11 = inlined_call_operand.vmem [shape: f32[1,128], index: 11, kind: input, shape index: {}]   ;;  %s1560_s12 = inlined_call_operand.hbm [shape: f32[16,128], index: 12, kind: output, shape index: {}]  }
   0x1   :  { %v1078_v0 = vld [vmem:[%s1550_s2] sm:$0xff]   ;;  %1052 = vmatprep.subr.bf16.mxu0 %v1198_v1  ;;  %v1079_v2 = vld [vmem:[%s1550_s2 + $0x8] sm:$0xff]   ;;  %1068 = vmatprep.mubr.msk.bf16.mxu0 %vm1199_vm0, %v1198_v1  ;;  %v1080_v3 = vld [vmem:[%s1550_s2 + $0x10] sm:$0xff]  }
   0x2   :  { %1053 = vmatpush3.bf16.msra.mxu0 %v1078_v0  ;;  %v1081_v4 = vld [vmem:[%s1550_s2 + $0x18] sm:$0xff]   ;;  %v1082_v5 = vld [vmem:[%s1550_s2 + $0x20] sm:$0xff]   ;;  %v1083_v6 = vld [vmem:[%s1550_s2 + $0x28] sm:$0xff]  }
   0x3   :  { %1054 = vmatprep.subr.bf16.mxu0 %v1198_v1  ;;  %v1084_v7 = vld [vmem:[%s1550_s2 + $0x30] sm:$0xff]   ;;  %v1085_v8 = vld [vmem:[%s1550_s2 + $0x38] sm:$0xff]   ;;  %v45_v9 = vld [vmem:[%s1548_s0] sm:$0xff] }
   0x4   :  { %v46_v10 = vld [vmem:[%s1548_s0 + $0x8] sm:$0xff] }
   0x5   :  { %v47_v11 = vpack.c.bf16 %v46_v10, %v45_v9 }
   0x6   :  { %1055 = vmatpush3.bf16.msra.mxu0 %v1079_v2 }
   0x7   :  { %1056 = vmatprep.subr.bf16.mxu0 %v1198_v1 }
   0xa   :  { %1057 = vmatpush3.bf16.msra.mxu0 %v1080_v3 }
   0xb   :  { %1058 = vmatprep.subr.bf16.mxu0 %v1198_v1 }
   0xe   :  { %1059 = vmatpush3.bf16.msra.mxu0 %v1081_v4 }
   0xf   :  { %1060 = vmatprep.subr.bf16.mxu0 %v1198_v1 }
  0x12   :  { %1061 = vmatpush3.bf16.msra.mxu0 %v1082_v5 }
  0x13   :  { %1062 = vmatprep.subr.bf16.mxu0 %v1198_v1 }
  0x16   :  { %1063 = vmatpush3.bf16.msra.mxu0 %v1083_v6 }
  0x17   :  { %1064 = vmatprep.subr.bf16.mxu0 %v1198_v1 }
  0x1a   :  { %1065 = vmatpush3.bf16.msra.mxu0 %v1084_v7 }
  0x1b   :  { %1066 = vmatprep.subr.bf16.mxu0 %v1198_v1 }
  0x1e   :  { %1067 = vmatpush3.bf16.msra.mxu0 %v1085_v8 }
  0x21   :  { %1069 = vmatmul.mubr.bf16.vlgmr.msra.gmra.mrb[0].mxu0 %v47_v11 }
  0x22   :  { %17 = vsyncpa [#allocation3], 0  ;;  %v921_v12 = vld [vmem:[%s1551_s3] ss:$0 sm:$0xff]  ;;  %v44_v21 = vld [vmem:[%s1549_s1 + $0x8] sm:$0xff]  ;;  %v1200_v57 = vmov 0  }
  0x23   :  { %v43_v14 = vld [vmem:[%s1549_s1] sm:$0xff]  ;;  %v1088_v24 = vld [vmem:[%s1554_s6 + $0x8] ss:$16 sps:$4 sm:$0xff]   ;;  %v1090_v25 = vld [vmem:[%s1554_s6 + $0xc] ss:$16 sps:$4 sm:$0xff]   ;;  %450 = vmatprep.mubr.bf16.mxu1 %v1200_v57  ;;  %493 = vmatprep.mubr.bf16.mxu0 %v1200_v57  ;;  %s1201_s2 = smov [#allocation2]  }
  0x24   :  { %v1086_v23 = vld [vmem:[%s1554_s6 + $0x4] ss:$16 sps:$4 sm:$0xff]   ;;  %v1091_v26 = vld [vmem:[%s1554_s6] ss:$16 sps:$4 sm:$0xff]   ;;  %461 = vmatprep.subr.bf16.mxu0 %v1090_v25  ;;  %v1096_v28 = vld [vmem:[%s1554_s6 + $0x2c] ss:$16 sps:$4 sm:$0xff]  }
  0x25   :  { %v1092_v27 = vld [vmem:[%s1554_s6 + $0x24] ss:$16 sps:$4 sm:$0xff]   ;;  %418 = vmatprep.subr.bf16.mxu1 %v1086_v23  ;;  %462 = vmatpush1.bf16.msra.mxu0 %v1088_v24  ;;  %v1094_v29 = vld [vmem:[%s1554_s6 + $0x28] ss:$16 sps:$4 sm:$0xff]   ;;  %v1097_v38 = vld [vmem:[%s1554_s6 + $0x20] ss:$16 sps:$4 sm:$0xff]  }
  0x26   :  { %419 = vmatpush1.bf16.msra.mxu1 %v1091_v26  ;;  %463 = vmatprep.subr.bf16.mxu0 %v1096_v28  ;;  %v1098_v39 = vld [vmem:[%s1554_s6 + $0x44] ss:$16 sps:$4 sm:$0xff]   ;;  %v1102_v40 = vld [vmem:[%s1554_s6 + $0x4c] ss:$16 sps:$4 sm:$0xff]   ;;  %v1100_v41 = vld [vmem:[%s1554_s6 + $0x48] ss:$16 sps:$4 sm:$0xff]  }
  0x27   :  { %420 = vmatprep.subr.bf16.mxu1 %v1092_v27  ;;  %v1103_v42 = vld [vmem:[%s1554_s6 + $0x40] ss:$16 sps:$4 sm:$0xff]   ;;  %v1104_v43 = vld [vmem:[%s1554_s6 + $0x64] ss:$16 sps:$4 sm:$0xff]   ;;  %v1108_v44 = vld [vmem:[%s1554_s6 + $0x6c] ss:$16 sps:$4 sm:$0xff]  }
  0x28   :  { %v1106_v45 = vld [vmem:[%s1554_s6 + $0x68] ss:$16 sps:$4 sm:$0xff]   ;;  %v1109_v46 = vld [vmem:[%s1554_s6 + $0x60] ss:$16 sps:$4 sm:$0xff]   ;;  %v1110_v47 = vld [vmem:[%s1554_s6 + $0x84] ss:$16 sps:$4 sm:$0xff]  }
  0x29   :  { %464 = vmatpush1.bf16.msra.mxu0 %v1094_v29  ;;  %v1112_v48 = vld [vmem:[%s1554_s6 + $0x88] ss:$16 sps:$4 sm:$0xff]   ;;  %v1114_v49 = vld [vmem:[%s1554_s6 + $0x8c] ss:$16 sps:$4 sm:$0xff]   ;;  %v1115_v50 = vld [vmem:[%s1554_s6 + $0x80] ss:$16 sps:$4 sm:$0xff]  }
  0x2a   :  { %421 = vmatpush1.bf16.msra.mxu1 %v1097_v38  ;;  %465 = vmatprep.subr.bf16.mxu0 %v1102_v40  ;;  %v1116_v51 = vld [vmem:[%s1554_s6 + $0xa4] ss:$16 sps:$4 sm:$0xff]   ;;  %v1120_v52 = vld [vmem:[%s1554_s6 + $0xac] ss:$16 sps:$4 sm:$0xff]   ;;  %v1118_v53 = vld [vmem:[%s1554_s6 + $0xa8] ss:$16 sps:$4 sm:$0xff]  }
  0x2b   :  { %422 = vmatprep.subr.bf16.mxu1 %v1098_v39  ;;  %v1121_v54 = vld [vmem:[%s1554_s6 + $0xa0] ss:$16 sps:$4 sm:$0xff]   ;;  %v1122_v55 = vld [vmem:[%s1554_s6 + $0xc4] ss:$16 sps:$4 sm:$0xff]   ;;  %v1126_v56 = vld [vmem:[%s1554_s6 + $0xcc] ss:$16 sps:$4 sm:$0xff]  }
  0x2c   :  { %v1124_v58 = vld [vmem:[%s1554_s6 + $0xc8] ss:$16 sps:$4 sm:$0xff]   ;;  %v1127_v59 = vld [vmem:[%s1554_s6 + $0xc0] ss:$16 sps:$4 sm:$0xff]   ;;  %v1128_v60 = vld [vmem:[%s1554_s6 + $0xe4] ss:$16 sps:$4 sm:$0xff]  }
  0x2d   :  { %466 = vmatpush1.bf16.msra.mxu0 %v1100_v41  ;;  %v1132_v61 = vld [vmem:[%s1554_s6 + $0xec] ss:$16 sps:$4 sm:$0xff]   ;;  %v1130_v62 = vld [vmem:[%s1554_s6 + $0xe8] ss:$16 sps:$4 sm:$0xff]   ;;  %v1133_v63 = vld [vmem:[%s1554_s6 + $0xe0] ss:$16 sps:$4 sm:$0xff]  }
  0x2e   :  { %423 = vmatpush1.bf16.msra.mxu1 %v1103_v42  ;;  %467 = vmatprep.subr.bf16.mxu0 %v1108_v44  ;;  %v1134_v0 = vld [vmem:[%s1556_s8 + $0x40] sm:$0xff]   ;;  %v1140_v23 = vld [vmem:[%s1556_s8 + $0x8] sm:$0xff]   ;;  %v1142_v25 = vld [vmem:[%s1556_s8 + $0x50] sm:$0xff]   ;;  %s910_s25 = sshll.u32 %s1201_s2, 4  ;;  %s911_s25 = int_to_ptr.vmem [resolvable:$true] %s910_s25 }
  0x2f   :  { %424 = vmatprep.subr.bf16.mxu1 %v1104_v43  ;;  %v1135_v1 = vld [vmem:[%s1556_s8 + $0xc0] sm:$0xff]   ;;  %v1141_v24 = vld [vmem:[%s1556_s8 + $0x88] sm:$0xff]   ;;  %v1143_v26 = vld [vmem:[%s1556_s8 + $0xd0] sm:$0xff]   ;;  %s1174_s0 = scalar_lea.vmem %s911_s25, 256  ;;  %p1179_p1 = scmp.lt.s32.totalorder %s911_s25, %s911_s25 }
  0x30   :  { %v930_v10 = vld [vmem:[%s1552_s4] ss:$0 sm:$0xff]  ;;  %v1144_v27 = vld [vmem:[%s1556_s8 + $0x10] sm:$0xff]   ;;  %v1146_v29 = vld [vmem:[%s1556_s8 + $0x58] sm:$0xff]   ;;  %p1175_p0 = scmp.ne.s32.totalorder %s911_s25, %s1174_s0  ;;  %p1180_p2 = scmp.lt.s32.totalorder %s1174_s0, %s1174_s0 }
  0x31   :  { %468 = vmatpush1.bf16.msra.mxu0 %v1106_v45  ;;  %v1145_v28 = vld [vmem:[%s1556_s8 + $0x90] sm:$0xff]   ;;  %v1155_v38 = vld [vmem:[%s1556_s8 + $0xe8] sm:$0xff]   ;;  %v1162_v45 = vld [vmem:[%s1556_s8 + $0x78] sm:$0xff]  }
  0x32   :  { %425 = vmatpush1.bf16.msra.mxu1 %v1109_v46  ;;  %469 = vmatprep.subr.bf16.mxu0 %v1114_v49  ;;  %v1156_v39 = vld [vmem:[%s1556_s8 + $0x28] sm:$0xff]   ;;  %v1158_v41 = vld [vmem:[%s1556_s8 + $0x70] sm:$0xff]   ;;  %v1163_v46 = vld [vmem:[%s1556_s8 + $0xf8] sm:$0xff]   ;;  %v238_v49 = vlaneseq  ;;  %p1181_p3 = por %p1180_p2, %p1179_p1 }
  0x33   :  { %426 = vmatprep.subr.bf16.mxu1 %v1110_v47  ;;  %v1157_v40 = vld [vmem:[%s1556_s8 + $0xa8] sm:$0xff]   ;;  %v1159_v42 = vld [vmem:[%s1556_s8 + $0xf0] sm:$0xff]   ;;  %v1164_v47 = vld [vmem:[%s1556_s8 + $0x38] sm:$0xff]  }
  0x34   :  { %v1160_v43 = vld [vmem:[%s1556_s8 + $0x30] sm:$0xff]   ;;  %p1182_p4 = pnand %p1181_p3, %p1175_p0 }
  0x35   :  { %470 = vmatpush1.bf16.msra.mxu0 %v1112_v48  ;;  %v1161_v44 = vld [vmem:[%s1556_s8 + $0xb0] sm:$0xff]   ;;  %v1165_v48 = vld [vmem:[%s1556_s8 + $0xb8] sm:$0xff]  }
  0x36   :  { %427 = vmatpush1.bf16.msra.mxu1 %v1115_v50  ;;  %471 = vmatprep.subr.bf16.mxu0 %v1120_v52  ;;  %v239_v50 = vshrl.u32 %v238_v49, 7 }
  0x37   :  { %428 = vmatprep.subr.bf16.mxu1 %v1116_v51 }
  0x38   :  { %v240_v51 = vsub.s32 0, %v239_v50  ;;  %v248_v52 = vsub.s32 2, %v239_v50 }
  0x39   :  { %472 = vmatpush1.bf16.msra.mxu0 %v1118_v53  ;;  %v236_v53 = vld [vmem:[%s1555_s7] sm:$0xf] }
  0x3a   :  { %429 = vmatpush1.bf16.msra.mxu1 %v1121_v54  ;;  %473 = vmatprep.subr.bf16.mxu0 %v1126_v56  ;;  %v244_v54 = vsub.s32 1, %v239_v50  ;;  %v241_v56 = vrot.slane %v236_v53, %v240_v51  ;;  %v249_v57 = vrot.slane %v236_v53, %v248_v52 }
  0x3b   :  { %430 = vmatprep.subr.bf16.mxu1 %v1122_v55  ;;  %v252_v55 = vsub.s32 3, %v239_v50 }
  0x3d   :  { %474 = vmatpush1.bf16.msra.mxu0 %v1124_v58  ;;  %v245_v58 = vrot.slane %v236_v53, %v244_v54 }
  0x3e   :  { %431 = vmatpush1.bf16.msra.mxu1 %v1127_v59  ;;  %475 = vmatprep.subr.bf16.mxu0 %v1132_v61  ;;  %v253_v59 = vrot.slane %v236_v53, %v252_v55 }
  0x3f   :  { %432 = vmatprep.subr.bf16.mxu1 %v1128_v60 }
  0x41   :  { %476 = vmatpush1.bf16.msra.mxu0 %v1130_v62 }
  0x42   :  { %433 = vmatpush1.bf16.msra.mxu1 %v1133_v63  ;;  %1030 = vmatprep.subr.bf16.mxu0 %v1135_v1 }
  0x43   :  { %1008 = vmatprep.subr.bf16.mxu1 %v1134_v0 }
  0xf4   :  { %v153_v13 = vpop.f32.mrb[0].mxu0 }
  0xf5   :  { %v154_v15 = vadd.f32 %v921_v12, %v153_v13  ;;  %v1070_v16 = vpop.f32.mrb[1].mxu0 }
  0xf6   :  { %v156_v17 = vpop.f32.mrb[2].mxu0 }
  0xf7   :  { %v157_v18 = vadd.f32 %v921_v12, %v156_v17  ;;  %v1071_v19 = vpop.f32.mrb[3].mxu0  ;;  %v160_v20 = vadd.f32 %v154_v15, %v43_v14  ;;  %v931_v14 = vld [vmem:[%s1553_s5] ss:$0 sm:$0xff] }
  0xf8   :  { %v1137_v19 = vld [vmem:[%s1556_s8 + $0x80] sm:$0xff]  }
  0xf9   :  { %162 = vadd.xlane.f32.xlu0 %v160_v20  ;;  %v161_v22 = vadd.f32 %v157_v18, %v44_v21  ;;  %v1136_v18 = vld [vmem:[%s1556_s8] sm:$0xff]   ;;  %v1138_v21 = vld [vmem:[%s1556_s8 + $0x48] sm:$0xff]  }
  0xfd   :  { %164 = vadd.xlane.f32.xlu0 %v161_v22 }
 0x186   :  { %v163_v30 = vpop.xlane.xlu0 %162 }
 0x187   :  { %v167_v31 = vmul.f32 0.0078125, %v163_v30  ;;  %v1147_v30 = vld [vmem:[%s1556_s8 + $0xd8] sm:$0xff]  }
 0x189   :  { %v1329_v32 = vsub.f32 %v160_v20, %v167_v31  ;;  %v1148_v31 = vld [vmem:[%s1556_s8 + $0x18] sm:$0xff]  }
 0x18a   :  { %v165_v33 = vpop.xlane.xlu0 %164 }
 0x18b   :  { %v168_v34 = vmul.f32 0.0078125, %v165_v33  ;;  %v171_v35 = vmul.f32 %v1329_v32, %v1329_v32  ;;  %v1150_v33 = vld [vmem:[%s1556_s8 + $0x60] sm:$0xff]  }
 0x18d   :  { %v1333_v36 = vsub.f32 %v161_v22, %v168_v34  ;;  %173 = vadd.xlane.f32.xlu1 %v171_v35  ;;  %v1139_v22 = vld [vmem:[%s1556_s8 + $0xc8] sm:$0xff]   ;;  %v1151_v34 = vld [vmem:[%s1556_s8 + $0xe0] sm:$0xff]  }
 0x18e   :  { %v1152_v35 = vld [vmem:[%s1556_s8 + $0x20] sm:$0xff]  }
 0x18f   :  { %v172_v37 = vmul.f32 %v1333_v36, %v1333_v36 }
 0x191   :  { %175 = vadd.xlane.f32.xlu1 %v172_v37  ;;  %v1154_v37 = vld [vmem:[%s1556_s8 + $0x68] sm:$0xff]  }
 0x21a   :  { %v174_v2 = vpop.xlane.xlu1 %173 }
 0x21b   :  { %v177_v3 = vmul.f32 0.0078125, %v174_v2 }
 0x21d   :  { %v179_v4 = vadd.f32 1e-05, %v177_v3 }
 0x21e   :  { %v176_v5 = vpop.xlane.xlu1 %175 }
 0x21f   :  { %1166 = vrsqrt.f32 %v179_v4  ;;  %v178_v6 = vmul.f32 0.0078125, %v176_v5 }
 0x221   :  { %v180_v7 = vadd.f32 1e-05, %v178_v6 }
 0x223   :  { %1168 = vrsqrt.f32 %v180_v7 }
 0x229   :  { %v1167_v8 = vpop.eup %1166 }
 0x22a   :  { %v183_v9 = vmul.f32 %v1167_v8, %v1329_v32  ;;  %v1149_v32 = vld [vmem:[%s1556_s8 + $0x98] sm:$0xff]  }
 0x22c   :  { %v192_v13 = vmul.f32 %v930_v10, %v183_v9 }
 0x22d   :  { %v1169_v11 = vpop.eup %1168 }
 0x22e   :  { %v184_v12 = vmul.f32 %v1169_v11, %v1333_v36  ;;  %v1426_v16 = vadd.f32 %v931_v14, %v192_v13  ;;  %v1153_v36 = vld [vmem:[%s1556_s8 + $0xa0] sm:$0xff]  }
 0x230   :  { %v193_v15 = vmul.f32 %v930_v10, %v184_v12 }
 0x232   :  { %v1428_v17 = vadd.f32 %v931_v14, %v193_v15 }
 0x234   :  { %v203_v20 = vpack.c.bf16 %v1428_v17, %v1426_v16 }
 0x236   :  { %451 = vmatmul.mubr.bf16.vlgmr.msra.gmra.mrb[0].mxu1 %v203_v20  ;;  %494 = vmatmul.mubr.bf16.vlgmr.msra.gmra.mrb[4].mxu0 %v203_v20 }
 0x237   :  { %1009 = vmatpush3.bf16.msra.mxu1 %v1136_v18  ;;  %1031 = vmatpush3.bf16.msra.mxu0 %v1137_v19 }
 0x238   :  { %1010 = vmatprep.subr.bf16.mxu1 %v1138_v21  ;;  %1032 = vmatprep.subr.bf16.mxu0 %v1139_v22 }
 0x23b   :  { %1011 = vmatpush3.bf16.msra.mxu1 %v1140_v23  ;;  %1033 = vmatpush3.bf16.msra.mxu0 %v1141_v24 }
 0x23c   :  { %1012 = vmatprep.subr.bf16.mxu1 %v1142_v25  ;;  %1034 = vmatprep.subr.bf16.mxu0 %v1143_v26 }
 0x23f   :  { %1013 = vmatpush3.bf16.msra.mxu1 %v1144_v27  ;;  %1035 = vmatpush3.bf16.msra.mxu0 %v1145_v28  ;;  %v964_v28 = vld [vmem:[%s1557_s9] ss:$0 sm:$0xff] }
 0x240   :  { %1014 = vmatprep.subr.bf16.mxu1 %v1146_v29  ;;  %1036 = vmatprep.subr.bf16.mxu0 %v1147_v30 }
 0x243   :  { %1015 = vmatpush3.bf16.msra.mxu1 %v1148_v31  ;;  %1037 = vmatpush3.bf16.msra.mxu0 %v1149_v32 }
 0x244   :  { %1016 = vmatprep.subr.bf16.mxu1 %v1150_v33  ;;  %1038 = vmatprep.subr.bf16.mxu0 %v1151_v34 }
 0x247   :  { %1017 = vmatpush3.bf16.msra.mxu1 %v1152_v35  ;;  %1039 = vmatpush3.bf16.msra.mxu0 %v1153_v36 }
 0x248   :  { %1018 = vmatprep.subr.bf16.mxu1 %v1154_v37  ;;  %1040 = vmatprep.subr.bf16.mxu0 %v1155_v38 }
 0x24b   :  { %1019 = vmatpush3.bf16.msra.mxu1 %v1156_v39  ;;  %1041 = vmatpush3.bf16.msra.mxu0 %v1157_v40 }
 0x24c   :  { %1020 = vmatprep.subr.bf16.mxu1 %v1158_v41  ;;  %1042 = vmatprep.subr.bf16.mxu0 %v1159_v42 }
 0x24f   :  { %1021 = vmatpush3.bf16.msra.mxu1 %v1160_v43  ;;  %1043 = vmatpush3.bf16.msra.mxu0 %v1161_v44 }
 0x250   :  { %1022 = vmatprep.subr.bf16.mxu1 %v1162_v45  ;;  %1044 = vmatprep.subr.bf16.mxu0 %v1163_v46 }
 0x253   :  { %1023 = vmatpush3.bf16.msra.mxu1 %v1164_v47  ;;  %1045 = vmatpush3.bf16.msra.mxu0 %v1165_v48 }
 0x309   :  { %v452_v60 = vpop.f32.mrb[0].mxu1  ;;  %v495_v61 = vpop.f32.mrb[4].mxu0 }
 0x30a   :  { %v453_v62 = vadd.f32 %v452_v60, %v241_v56  ;;  %v496_v63 = vadd.f32 %v495_v61, %v249_v57  ;;  %v454_v0 = vpop.f32.mrb[1].mxu1  ;;  %v497_v1 = vpop.f32.mrb[5].mxu0  ;;  %v998_v61 = vld [vmem:[%s1559_s11] ss:$0 sm:$0xff] }
 0x30b   :  { %v455_v2 = vadd.f32 %v454_v0, %v245_v58  ;;  %v498_v3 = vadd.f32 %v497_v1, %v253_v59  ;;  %v456_v4 = vpop.f32.mrb[2].mxu1  ;;  %v499_v5 = vpop.f32.mrb[6].mxu0 }
 0x30c   :  { %v457_v6 = vadd.f32 %v456_v4, %v241_v56  ;;  %v500_v7 = vadd.f32 %v499_v5, %v249_v57  ;;  %v458_v8 = vpop.f32.mrb[3].mxu1  ;;  %v501_v9 = vpop.f32.mrb[7].mxu0  ;;  %v504_v12 = vmax.f32 %v453_v62, 0.0  ;;  %v506_v13 = vmax.f32 %v496_v63, 0.0 }
 0x30d   :  { %v459_v10 = vadd.f32 %v458_v8, %v245_v58  ;;  %v502_v11 = vadd.f32 %v501_v9, %v253_v59  ;;  %v505_v18 = vmax.f32 %v455_v2, 0.0  ;;  %v507_v19 = vmax.f32 %v498_v3, 0.0  ;;  %v997_v58 = vld [vmem:[%s1558_s10] ss:$0 sm:$0xff] }
 0x30e   :  { %v508_v14 = vmax.f32 %v457_v6, 0.0  ;;  %v510_v15 = vmax.f32 %v500_v7, 0.0 }
 0x30f   :  { %v509_v20 = vmax.f32 %v459_v10, 0.0  ;;  %v511_v21 = vmax.f32 %v502_v11, 0.0 }
 0x310   :  { %v512_v22 = vpack.c.bf16 %v508_v14, %v504_v12  ;;  %v514_v23 = vpack.c.bf16 %v510_v15, %v506_v13 }
 0x311   :  { %v513_v24 = vpack.c.bf16 %v509_v20, %v505_v18  ;;  %v515_v25 = vpack.c.bf16 %v511_v21, %v507_v19 }
 0x313   :  { %811 = vmatprep.mubr.bf16.mxu1 %v513_v24  ;;  %852 = vmatprep.mubr.bf16.mxu0 %v515_v25 }
 0x314   :  { %812 = vmatmul.mubr.bf16.vlgmr.msra.gmra.mrb[4].mxu1 %v512_v22  ;;  %853 = vmatmul.mubr.bf16.vlgmr.msra.gmra.mrb[8].mxu0 %v514_v23 }
 0x3e7   :  { %v1024_v26 = vpop.f32.mrb[4].mxu1  ;;  %v1046_v27 = vpop.f32.mrb[8].mxu0 }
 0x3e8   :  { %v1025_v29 = vpop.f32.mrb[5].mxu1  ;;  %v1047_v30 = vpop.f32.mrb[9].mxu0 }
 0x3e9   :  { %v1026_v31 = vadd.f32 %v1025_v29, %v1024_v26  ;;  %v1048_v32 = vadd.f32 %v1047_v30, %v1046_v27  ;;  %v1027_v33 = vpop.f32.mrb[6].mxu1  ;;  %v1049_v34 = vpop.f32.mrb[10].mxu0 }
 0x3ea   :  { %v1028_v35 = vpop.f32.mrb[7].mxu1  ;;  %v1050_v36 = vpop.f32.mrb[11].mxu0 }
 0x3eb   :  { %v814_v37 = vadd.f32 %v1026_v31, %v964_v28  ;;  %v1029_v38 = vadd.f32 %v1028_v35, %v1027_v33  ;;  %v1051_v39 = vadd.f32 %v1050_v36, %v1049_v34 }
 0x3ed   :  { %v855_v40 = vadd.f32 %v1048_v32, %v814_v37  ;;  %v817_v41 = vadd.f32 %v1029_v38, %v964_v28 }
 0x3ef   :  { %v858_v42 = vadd.f32 %v1051_v39, %v817_v41  ;;  %v861_v43 = vadd.f32 %v855_v40, %v1426_v16 }
 0x3f1   :  { %863 = vadd.xlane.f32.xlu0 %v861_v43  ;;  %v862_v44 = vadd.f32 %v858_v42, %v1428_v17 }
 0x3f3   :  { %865 = vadd.xlane.f32.xlu1 %v862_v44 }
 0x47e   :  { %v864_v45 = vpop.xlane.xlu0 %863 }
 0x47f   :  { %v867_v46 = vmul.f32 0.0078125, %v864_v45 }
 0x480   :  { %v866_v47 = vpop.xlane.xlu1 %865 }
 0x481   :  { %v869_v48 = vsub.f32 %v861_v43, %v867_v46  ;;  %v868_v49 = vmul.f32 0.0078125, %v866_v47 }
 0x483   :  { %v870_v50 = vsub.f32 %v862_v44, %v868_v49  ;;  %v871_v51 = vmul.f32 %v869_v48, %v869_v48 }
 0x485   :  { %873 = vadd.xlane.f32.xlu0 %v871_v51  ;;  %v872_v52 = vmul.f32 %v870_v50, %v870_v50 }
 0x487   :  { %875 = vadd.xlane.f32.xlu1 %v872_v52 }
 0x512   :  { %v874_v53 = vpop.xlane.xlu0 %873 }
 0x513   :  { %v877_v54 = vmul.f32 0.0078125, %v874_v53 }
 0x514   :  { %v876_v55 = vpop.xlane.xlu1 %875 }
 0x515   :  { %v879_v56 = vadd.f32 1e-05, %v877_v54  ;;  %v878_v57 = vmul.f32 0.0078125, %v876_v55 }
 0x517   :  { %1170 = vrsqrt.f32 %v879_v56  ;;  %v880_v16 = vadd.f32 1e-05, %v878_v57 }
 0x519   :  { %1172 = vrsqrt.f32 %v880_v16 }
 0x521   :  { %v1171_v17 = vpop.eup %1170 }
 0x522   :  { %v883_v59 = vmul.f32 %v1171_v17, %v869_v48 }
 0x523   :  { %v1173_v60 = vpop.eup %1172 }
 0x524   :  { %v884_v62 = vmul.f32 %v1173_v60, %v870_v50  ;;  %v892_v63 = vmul.f32 %v997_v58, %v883_v59 }
 0x526   :  { %v893_v0 = vmul.f32 %v997_v58, %v884_v62  ;;  %v901_v1 = vadd.f32 %v998_v61, %v892_v63 }
 0x528   :  { %v902_v2 = vadd.f32 %v998_v61, %v893_v0  ;;  %903 = vst [vmem:[#allocation2] sm:$0xff] %v901_v1 }
 0x52a   :  { %904 = vst [vmem:[#allocation2 + $0x8] sm:$0xff] %v902_v2 }
 0x52b   :  { %1185 = shalt.err (!%p1182_p4)
}
 0x52c   :  { %s1186_s11 = scalar_lea.hbm %s1560_s12, 256 }
 0x52d   :  { %p1187_p5 = scmp.ne.s32.totalorder %s1560_s12, %s1186_s11  ;;  %p1190_p6 = scmp.lt.u32.totalorder %s1186_s11, %s1560_s12 }
 0x52f   :  { %p1192_p7 = pnand %p1190_p6, %p1187_p5 }
 0x531   :  { %1195 = shalt.err (!%p1192_p7)
}
 0x532   :  { %s1202_s29 = smov 128   ;;  %s1203_s30 = smov 8  }
 0x533   :  { %916 = dma.vmem_to_hbm [thread:$0]  %s911_s25, 256, %s1560_s12, [#allocation3], %s1202_s29, %s1202_s29, %s1203_s30  }
 0x534   :  { %1196 = dma.done.wait [#allocation3], 256  }
 0x535   :  { %1197 = vsyncadd [#allocation3], 4294967040 }
 0x536   :  { %920 = vsyncpa [#allocation3], 1 }

</bundles_post_ra>
